<compile_context>
chip_gen: v5e
topology: v5e:2x2
jax: 0.10.0
libtpu: 0.0.40
codegen_flags: <defaults>
</compile_context>

<pallas_src>
import functools

import numpy as np
import jax
import jax.numpy as jnp
from jax.experimental import pallas as pl
from jax.experimental.pallas import tpu as pltpu

LANE = 128       # TPU lane width; head / output are padded to this.
TB_TARGET = 8    # images per grid step (fills the 128-row MXU on v5e).
                 # Perf note: use 16 on v6e/v7x (256-row MXU); VMEM is a
                 # non-issue on every generation for this kernel.


# ----------------------------------------------------------------------------
# Fused kernel: conv3x3(+bias,ReLU) -> global-avg-pool -> fc -> coral
# One grid step processes TB images stacked along the row (sublane/M) axis.
#   x_ref     : (TB*Hp, Wp*C_in)   padded NHWC images, (W,C) folded to lanes
#   wband_ref : (3, Wp*C_in, W*C_hid)  banded conv weights (kj taps pre-summed)
#   bconv_ref : (1, W*C_hid)           conv bias tiled per output pixel column
#   head_ref  : (W*C_hid, LANE)        fused pool@fc@coral weights (padded)
#   bhead_ref : (1, LANE)              fused fc/coral bias (padded)
#   o_ref     : (TB, LANE)             logits (first K-1 lanes valid)
# ----------------------------------------------------------------------------
def _fused_coral_kernel(x_ref, wband_ref, bconv_ref, head_ref, bhead_ref,
                        o_ref, *, tb, hp, h_out):
    m = tb * hp - 2  # conv-output rows covering the whole TB-image slab
    # 3x3 conv as 3 accumulating MXU matmuls: the 3 horizontal taps live in
    # each banded weight; the 3 vertical taps are shifted row slices.  The
    # zero pad rows between stacked images prevent cross-image leakage.
    acc = jnp.dot(x_ref[0:m, :], wband_ref[0],
                  preferred_element_type=jnp.float32)
    acc = acc + jnp.dot(x_ref[1:1 + m, :], wband_ref[1],
                        preferred_element_type=jnp.float32)
    acc = acc + jnp.dot(x_ref[2:2 + m, :], wband_ref[2],
                        preferred_element_type=jnp.float32)
    hidden = jnp.maximum(acc + bconv_ref[...], 0.0)        # (m, W*C_hid)
    # Per-image row selection (sums the H valid conv rows of each image;
    # junk rows between images are excluded).  Built from iotas -> no DMA.
    row = jax.lax.broadcasted_iota(jnp.int32, (tb, m), 0)
    col = jax.lax.broadcasted_iota(jnp.int32, (tb, m), 1)
    valid = (col >= row * hp) & (col < row * hp + h_out)
    sel = jnp.where(valid, jnp.float32(1.0), jnp.float32(0.0))
    s = jnp.dot(sel, hidden, preferred_element_type=jnp.float32)  # (TB, W*C_hid)
    # Fused pool -> fc -> coral epilogue: one matmul + bias.
    logits = jnp.dot(s, head_ref[...],
                     preferred_element_type=jnp.float32) + bhead_ref[...]
    o_ref[...] = logits.astype(o_ref.dtype)                # lane-dense 2-D store


# ----------------------------------------------------------------------------
# One-time weight re-layout (hoisted out of the forward pass).
# ----------------------------------------------------------------------------
def prepare_coral_params(params, H, W):
    w_conv = np.asarray(params["w_conv"], np.float64)   # (C_hid, C_in, 3, 3)
    b_conv = np.asarray(params["b_conv"], np.float64)   # (C_hid,)
    w_fc = np.asarray(params["w_fc"], np.float64)       # (FC_OUT, C_hid)
    b_fc = np.asarray(params["b_fc"], np.float64)       # (FC_OUT,)
    w_cor = np.asarray(params["w_coral"], np.float64)   # (K-1, FC_OUT)
    b_cor = np.asarray(params["b_coral"], np.float64)   # (K-1,)
    C_hid, C_in = w_conv.shape[0], w_conv.shape[1]
    k_m1 = w_cor.shape[0]
    assert k_m1 <= LANE
    Wp = W + 2

    # Banded conv weights, one per vertical tap ki: the three kj taps occupy
    # disjoint (input-col, output-col) bands and are summed into one matrix.
    w_band = np.zeros((3, Wp * C_in, W * C_hid))
    eye_w = np.eye(W)
    for ki in range(3):
        for kj in range(3):
            shift = np.zeros((Wp, W))
            shift[kj:kj + W, :] = eye_w            # in col w+kj -> out col w
            w_band[ki] += np.kron(shift, w_conv[:, :, ki, kj].T)
    b_conv_big = np.tile(b_conv, W).reshape(1, W * C_hid)

    # Exact algebraic fusion of pool (mean over H*W) -> fc -> coral.
    small = (w_fc.T @ w_cor.T) / float(H * W)      # (C_hid, K-1)
    head = np.zeros((W * C_hid, LANE))
    head[:, :k_m1] = np.tile(small, (W, 1))
    b_head = np.zeros((1, LANE))
    b_head[0, :k_m1] = b_fc @ w_cor.T + b_cor

    return {
        "w_band": jnp.asarray(w_band, jnp.float32),
        "b_conv": jnp.asarray(b_conv_big, jnp.float32),
        "head": jnp.asarray(head, jnp.float32),
        "b_head": jnp.asarray(b_head, jnp.float32),
        "k_m1": k_m1,
    }


# ----------------------------------------------------------------------------
# Forward pass wrapper.
# ----------------------------------------------------------------------------
def coral_forward(x, prep):
    B, C_in, H, W = x.shape
    Hp, Wp = H + 2, W + 2
    wc_hid = prep["w_band"].shape[-1]

    if B <= TB_TARGET:
        tb, b_pad = B, B                 # whole batch in one grid step
    else:
        tb = TB_TARGET
        b_pad = pl.cdiv(B, tb) * tb      # pad batch with zero images

    # NCHW -> padded NHWC, (W, C_in) folded into lanes, all padded images
    # stacked along the row axis.  (For production, feed NHWC directly so
    # this transpose/pad is not an extra HBM pass outside the kernel.)
    x_nhwc = jnp.transpose(x, (0, 2, 3, 1))
    x_pad = jnp.pad(x_nhwc, ((0, b_pad - B), (1, 1), (1, 1), (0, 0)))
    x_rows = x_pad.reshape(b_pad * Hp, Wp * C_in)

    m = tb * Hp - 2
    flops = 2 * (b_pad // tb) * (3 * m * (Wp * C_in) * wc_hid
                                 + tb * m * wc_hid
                                 + tb * wc_hid * LANE)
    bytes_accessed = 4 * (x_rows.size + prep["w_band"].size
                          + prep["b_conv"].size + prep["head"].size
                          + prep["b_head"].size + b_pad * LANE)

    kernel = functools.partial(_fused_coral_kernel, tb=tb, hp=Hp, h_out=H)
    out = pl.pallas_call(
        kernel,
        out_shape=jax.ShapeDtypeStruct((b_pad, LANE), jnp.float32),
        grid=(b_pad // tb,),
        in_specs=[
            pl.BlockSpec((tb * Hp, Wp * C_in), lambda i: (i, 0)),
            pl.BlockSpec((3, Wp * C_in, wc_hid), lambda i: (0, 0, 0)),
            pl.BlockSpec((1, wc_hid), lambda i: (0, 0)),
            pl.BlockSpec((wc_hid, LANE), lambda i: (0, 0)),
            pl.BlockSpec((1, LANE), lambda i: (0, 0)),
        ],
        out_specs=pl.BlockSpec((tb, LANE), lambda i: (i, 0)),
        compiler_params=pltpu.CompilerParams(
            dimension_semantics=("parallel",)),
        cost_estimate=pl.CostEstimate(flops=flops, transcendentals=0,
                                      bytes_accessed=bytes_accessed),
    )(x_rows, prep["w_band"], prep["b_conv"], prep["head"], prep["b_head"])
    return out[:B, :prep["k_m1"]]


def coral_predict(x, prep):
    # torch.sum(sigmoid(logits) > 0.5, dim=1)
    logits = coral_forward(x, prep)
    return jnp.sum(jax.nn.sigmoid(logits) > 0.5, axis=1)


# ----------------------------------------------------------------------------
# Pure-JAX reference for correctness checking
# ----------------------------------------------------------------------------
def coral_forward_ref(x, params):
    hi = jax.lax.Precision.HIGHEST
    h = jax.lax.conv_general_dilated(
        x, params["w_conv"], window_strides=(1, 1), padding="SAME",
        dimension_numbers=("NCHW", "OIHW", "NCHW"), precision=hi)
    h = jnp.maximum(h + params["b_conv"][None, :, None, None], 0.0)
    pooled = jnp.mean(h, axis=(2, 3))                                # (B, C_hid)
    feats = jnp.dot(pooled, params["w_fc"].T, precision=hi) + params["b_fc"]
    return jnp.dot(feats, params["w_coral"].T, precision=hi) + params["b_coral"]


if __name__ == "__main__":
    B, C_IN, H, W = 2, 4, 16, 16
    C_HID = 8          # conv output channels (W*C_HID == 128, lane-dense)
    FC_OUT = 32        # base_model.fc.out_features
    NUM_CLASSES = 5    # coral head -> NUM_CLASSES - 1 = 4 logits

    key = jax.random.PRNGKey(0)
    kx, k1, k2, k3, k4, k5, k6, kx2 = jax.random.split(key, 8)

    params = {
        # Conv2d(C_IN, C_HID, kernel_size=3, padding=1): weight (O, I, kH, kW)
        "w_conv": jax.random.normal(k1, (C_HID, C_IN, 3, 3), jnp.float32) * 0.1,
        "b_conv": jax.random.normal(k2, (C_HID,), jnp.float32) * 0.1,
        # base_model.fc: Linear(C_HID, FC_OUT): weight (out, in)
        "w_fc": jax.random.normal(k3, (FC_OUT, C_HID), jnp.float32) * 0.1,
        "b_fc": jax.random.normal(k4, (FC_OUT,), jnp.float32) * 0.1,
        # coral_layers: Linear(FC_OUT, NUM_CLASSES - 1)
        "w_coral": jax.random.normal(k5, (NUM_CLASSES - 1, FC_OUT),
                                     jnp.float32) * 0.1,
        "b_coral": jax.random.normal(k6, (NUM_CLASSES - 1,), jnp.float32) * 0.1,
    }
    prep = prepare_coral_params(params, H, W)          # one-time re-layout

    fwd = jax.jit(functools.partial(coral_forward, prep=prep))
    pred = jax.jit(functools.partial(coral_predict, prep=prep))

    # Small batch (single grid step).
    x = jax.random.normal(kx, (B, C_IN, H, W), dtype=jnp.float32)
    logits = jax.block_until_ready(fwd(x))
    ref = jax.block_until_ready(coral_forward_ref(x, params))
    assert logits.shape == (B, NUM_CLASSES - 1)
    max_err = jnp.max(jnp.abs(logits - ref))
    assert jnp.allclose(logits, ref, atol=2e-3, rtol=2e-3), (
        f"max abs err {max_err}")

    preds = jax.block_until_ready(pred(x))
    assert preds.shape == (B,)

    # Larger batch exercising the batched (TB per step) multi-step grid path.
    B2 = 20
    x2 = jax.random.normal(kx2, (B2, C_IN, H, W), dtype=jnp.float32)
    logits2 = jax.block_until_ready(
        jax.jit(functools.partial(coral_forward, prep=prep))(x2))
    ref2 = jax.block_until_ready(coral_forward_ref(x2, params))
    assert logits2.shape == (B2, NUM_CLASSES - 1)
    max_err2 = jnp.max(jnp.abs(logits2 - ref2))
    assert jnp.allclose(logits2, ref2, atol=2e-3, rtol=2e-3), (
        f"max abs err {max_err2}")

    print("KERNEL_OK")
</pallas_src>

<mosaic_0001>
module attributes {stable_mosaic.version = 11 : i64} {
  func.func @_fused_coral_kernel(%arg0: i32, %arg1: memref<36x72xf32, #tpu.memory_space<vmem>>, %arg2: memref<3x72x128xf32, #tpu.memory_space<vmem>>, %arg3: memref<1x128xf32, #tpu.memory_space<vmem>>, %arg4: memref<128x128xf32, #tpu.memory_space<vmem>>, %arg5: memref<1x128xf32, #tpu.memory_space<vmem>>, %arg6: memref<2x128xf32, #tpu.memory_space<vmem>>) attributes {dimension_semantics = [#tpu.dimension_semantics<parallel>], iteration_bounds = array<i64: 1>, scalar_prefetch = 0 : i64, scratch_operands = 0 : i64, tpu.core_type = #tpu.core_type<tc>, window_params = [{transform_indices = @transform_0, window_bounds = array<i64: 36, 72>}, {pipeline_mode = #tpu.pipeline_mode<synchronous>, transform_indices = @transform_1, window_bounds = array<i64: 3, 72, 128>}, {pipeline_mode = #tpu.pipeline_mode<synchronous>, transform_indices = @transform_2, window_bounds = array<i64: 1, 128>}, {pipeline_mode = #tpu.pipeline_mode<synchronous>, transform_indices = @transform_3, window_bounds = array<i64: 128, 128>}, {pipeline_mode = #tpu.pipeline_mode<synchronous>, transform_indices = @transform_4, window_bounds = array<i64: 1, 128>}, {transform_indices = @transform_5, window_bounds = array<i64: 2, 128>}]} {
    %c0 = arith.constant 0 : index
    %c0_0 = arith.constant 0 : index
    %0 = vector.load %arg1[%c0, %c0_0] : memref<36x72xf32, #tpu.memory_space<vmem>>, vector<34x72xf32>
    %c0_1 = arith.constant 0 : index
    %c0_2 = arith.constant 0 : index
    %c0_3 = arith.constant 0 : index
    %1 = vector.load %arg2[%c0_1, %c0_2, %c0_3] : memref<3x72x128xf32, #tpu.memory_space<vmem>>, vector<1x72x128xf32>
    %2 = vector.shape_cast %1 : vector<1x72x128xf32> to vector<72x128xf32>
    %cst = arith.constant dense<0.000000e+00> : vector<34x128xf32>
    %3 = tpu.matmul %0, %2, %cst {dimension_numbers = #tpu.dot_dimension_numbers<[1], [0], [0], [1], [0, 0, 1, 1], [], []>} : vector<34x72xf32>, vector<72x128xf32>, vector<34x128xf32> -> vector<34x128xf32>
    %c1 = arith.constant 1 : index
    %c0_4 = arith.constant 0 : index
    %4 = vector.load %arg1[%c1, %c0_4] : memref<36x72xf32, #tpu.memory_space<vmem>>, vector<34x72xf32>
    %c1_5 = arith.constant 1 : index
    %c0_6 = arith.constant 0 : index
    %c0_7 = arith.constant 0 : index
    %5 = vector.load %arg2[%c1_5, %c0_6, %c0_7] : memref<3x72x128xf32, #tpu.memory_space<vmem>>, vector<1x72x128xf32>
    %6 = vector.shape_cast %5 : vector<1x72x128xf32> to vector<72x128xf32>
    %cst_8 = arith.constant dense<0.000000e+00> : vector<34x128xf32>
    %7 = tpu.matmul %4, %6, %cst_8 {dimension_numbers = #tpu.dot_dimension_numbers<[1], [0], [0], [1], [0, 0, 1, 1], [], []>} : vector<34x72xf32>, vector<72x128xf32>, vector<34x128xf32> -> vector<34x128xf32>
    %8 = arith.addf %3, %7 : vector<34x128xf32>
    %c2 = arith.constant 2 : index
    %c0_9 = arith.constant 0 : index
    %9 = vector.load %arg1[%c2, %c0_9] : memref<36x72xf32, #tpu.memory_space<vmem>>, vector<34x72xf32>
    %c2_10 = arith.constant 2 : index
    %c0_11 = arith.constant 0 : index
    %c0_12 = arith.constant 0 : index
    %10 = vector.load %arg2[%c2_10, %c0_11, %c0_12] : memref<3x72x128xf32, #tpu.memory_space<vmem>>, vector<1x72x128xf32>
    %11 = vector.shape_cast %10 : vector<1x72x128xf32> to vector<72x128xf32>
    %cst_13 = arith.constant dense<0.000000e+00> : vector<34x128xf32>
    %12 = tpu.matmul %9, %11, %cst_13 {dimension_numbers = #tpu.dot_dimension_numbers<[1], [0], [0], [1], [0, 0, 1, 1], [], []>} : vector<34x72xf32>, vector<72x128xf32>, vector<34x128xf32> -> vector<34x128xf32>
    %13 = arith.addf %8, %12 : vector<34x128xf32>
    %c0_14 = arith.constant 0 : index
    %c0_15 = arith.constant 0 : index
    %14 = vector.load %arg3[%c0_14, %c0_15] : memref<1x128xf32, #tpu.memory_space<vmem>>, vector<1x128xf32>
    %15 = vector.broadcast %14 : vector<1x128xf32> to vector<34x128xf32>
    %16 = arith.addf %13, %15 : vector<34x128xf32>
    %cst_16 = arith.constant 0.000000e+00 : f32
    %17 = vector.broadcast %cst_16 : f32 to vector<34x128xf32>
    %18 = arith.maximumf %16, %17 : vector<34x128xf32>
    %19 = tpu.iota {dimensions = array<i32: 0>} : vector<2x34xi32>
    %20 = tpu.iota {dimensions = array<i32: 1>} : vector<2x34xi32>
    %c18_i32 = arith.constant 18 : i32
    %21 = vector.broadcast %c18_i32 : i32 to vector<2x34xi32>
    %22 = arith.muli %19, %21 : vector<2x34xi32>
    %23 = arith.cmpi sge, %20, %22 : vector<2x34xi32>
    %c18_i32_17 = arith.constant 18 : i32
    %24 = vector.broadcast %c18_i32_17 : i32 to vector<2x34xi32>
    %25 = arith.muli %19, %24 : vector<2x34xi32>
    %c16_i32 = arith.constant 16 : i32
    %26 = vector.broadcast %c16_i32 : i32 to vector<2x34xi32>
    %27 = arith.addi %25, %26 : vector<2x34xi32>
    %28 = arith.cmpi slt, %20, %27 : vector<2x34xi32>
    %29 = arith.andi %23, %28 : vector<2x34xi1>
    %cst_18 = arith.constant 1.000000e+00 : f32
    %cst_19 = arith.constant 0.000000e+00 : f32
    %30 = vector.broadcast %cst_18 : f32 to vector<2x34xf32>
    %31 = vector.broadcast %cst_19 : f32 to vector<2x34xf32>
    %32 = arith.select %29, %30, %31 : vector<2x34xi1>, vector<2x34xf32>
    %cst_20 = arith.constant dense<0.000000e+00> : vector<2x128xf32>
    %33 = tpu.matmul %32, %18, %cst_20 {dimension_numbers = #tpu.dot_dimension_numbers<[1], [0], [0], [1], [0, 0, 1, 1], [], []>} : vector<2x34xf32>, vector<34x128xf32>, vector<2x128xf32> -> vector<2x128xf32>
    %c0_21 = arith.constant 0 : index
    %c0_22 = arith.constant 0 : index
    %34 = vector.load %arg4[%c0_21, %c0_22] : memref<128x128xf32, #tpu.memory_space<vmem>>, vector<128x128xf32>
    %cst_23 = arith.constant dense<0.000000e+00> : vector<2x128xf32>
    %35 = tpu.matmul %33, %34, %cst_23 {dimension_numbers = #tpu.dot_dimension_numbers<[1], [0], [0], [1], [0, 0, 1, 1], [], []>} : vector<2x128xf32>, vector<128x128xf32>, vector<2x128xf32> -> vector<2x128xf32>
    %c0_24 = arith.constant 0 : index
    %c0_25 = arith.constant 0 : index
    %36 = vector.load %arg5[%c0_24, %c0_25] : memref<1x128xf32, #tpu.memory_space<vmem>>, vector<1x128xf32>
    %37 = vector.broadcast %36 : vector<1x128xf32> to vector<2x128xf32>
    %38 = arith.addf %35, %37 : vector<2x128xf32>
    %c0_26 = arith.constant 0 : index
    %c0_27 = arith.constant 0 : index
    %39 = vector.load %arg6[%c0_26, %c0_27] : memref<2x128xf32, #tpu.memory_space<vmem>>, vector<2x128xf32>
    tpu.vector_store %arg6[%c0_26, %c0_27], %38 {strides = array<i32>} : memref<2x128xf32, #tpu.memory_space<vmem>>, vector<2x128xf32>,
    return
  }
  func.func @transform_0(%arg0: i32) -> (i32, i32) {
    %c0_i32 = arith.constant 0 : i32
    %c0_i32_0 = arith.constant 0 : i32
    return %arg0, %c0_i32 : i32, i32
  }
  func.func @transform_1(%arg0: i32) -> (i32, i32, i32) {
    %c0_i32 = arith.constant 0 : i32
    %c0_i32_0 = arith.constant 0 : i32
    %c0_i32_1 = arith.constant 0 : i32
    %c0_i32_2 = arith.constant 0 : i32
    return %c0_i32, %c0_i32_0, %c0_i32_1 : i32, i32, i32
  }
  func.func @transform_2(%arg0: i32) -> (i32, i32) {
    %c0_i32 = arith.constant 0 : i32
    %c0_i32_0 = arith.constant 0 : i32
    %c0_i32_1 = arith.constant 0 : i32
    return %c0_i32, %c0_i32_0 : i32, i32
  }
  func.func @transform_3(%arg0: i32) -> (i32, i32) {
    %c0_i32 = arith.constant 0 : i32
    %c0_i32_0 = arith.constant 0 : i32
    %c0_i32_1 = arith.constant 0 : i32
    return %c0_i32, %c0_i32_0 : i32, i32
  }
  func.func @transform_4(%arg0: i32) -> (i32, i32) {
    %c0_i32 = arith.constant 0 : i32
    %c0_i32_0 = arith.constant 0 : i32
    %c0_i32_1 = arith.constant 0 : i32
    return %c0_i32, %c0_i32_0 : i32, i32
  }
  func.func @transform_5(%arg0: i32) -> (i32, i32) {
    %c0_i32 = arith.constant 0 : i32
    %c0_i32_0 = arith.constant 0 : i32
    return %arg0, %c0_i32 : i32, i32
  }
}

</mosaic_0001>

<bundles_post_ra>
// kernel: coral_forward.1
= control target key start
LH: loop header
LB: loop body
LE: loop exit
PB: predicated region body
PF: predicated region fallthrough
CT: control target
= control target key end

     0   :  { %s616_s0 = inlined_call_operand.vmem [shape: f32[36,72], index: 0, kind: input, shape index: {}]   ;;  %s617_s1 = inlined_call_operand.vmem [shape: f32[3,72,128], index: 1, kind: input, shape index: {}]   ;;  %s618_s2 = inlined_call_operand.vmem [shape: f32[1,128], index: 2, kind: input, shape index: {}]   ;;  %s619_s3 = inlined_call_operand.vmem [shape: f32[128,128], index: 3, kind: input, shape index: {}]   ;;  %s620_s4 = inlined_call_operand.vmem [shape: f32[1,128], index: 4, kind: input, shape index: {}]   ;;  %s621_s5 = inlined_call_operand.hbm [shape: f32[2,128], index: 5, kind: output, shape index: {}]  }
   0x1   :  { %v348_v0 = vld [vmem:[%s617_s1 + $0xd0] sm:$0xff]  ;;  %v347_v1 = vld [vmem:[%s617_s1 + $0xc8] sm:$0xff]  ;;  %v34_v3 = vld [vmem:[%s617_s1 + $0x40] sm:$0xff] }
   0x2   :  { %v329_v2 = vld [vmem:[%s617_s1 + $0x88] sm:$0xff]  ;;  %182 = vmatpush.msra.mxu2 %v348_v0  ;;  %v328_v4 = vld [vmem:[%s617_s1 + $0x80] sm:$0xff]  ;;  %120 = vmatpush.msra.mxu1 %v34_v3  ;;  %v33_v6 = vld [vmem:[%s617_s1 + $0x38] sm:$0xff] }
   0x3   :  { %73 = vmatpush.msra.mxu0 %v329_v2  ;;  %v346_v5 = vld [vmem:[%s617_s1 + $0xc0] sm:$0xff]  ;;  %v327_v7 = vld [vmem:[%s617_s1 + $0x78] sm:$0xff]  ;;  %v32_v8 = vld [vmem:[%s617_s1 + $0x30] sm:$0xff] }
   0x4   :  { %183 = vmatpush.msra.mxu2 %v347_v1  ;;  %121 = vmatpush.msra.mxu1 %v33_v6  ;;  %v345_v9 = vld [vmem:[%s617_s1 + $0xb8] sm:$0xff]  ;;  %v326_v10 = vld [vmem:[%s617_s1 + $0x70] sm:$0xff]  ;;  %v31_v11 = vld [vmem:[%s617_s1 + $0x28] sm:$0xff] }
   0x5   :  { %74 = vmatpush.msra.mxu0 %v328_v4  ;;  %v344_v12 = vld [vmem:[%s617_s1 + $0xb0] sm:$0xff]  ;;  %v325_v13 = vld [vmem:[%s617_s1 + $0x68] sm:$0xff]  ;;  %v30_v14 = vld [vmem:[%s617_s1 + $0x20] sm:$0xff] }
   0x6   :  { %184 = vmatpush.msra.mxu2 %v346_v5  ;;  %122 = vmatpush.msra.mxu1 %v32_v8  ;;  %v343_v15 = vld [vmem:[%s617_s1 + $0xa8] sm:$0xff]  ;;  %v324_v16 = vld [vmem:[%s617_s1 + $0x60] sm:$0xff]  ;;  %v29_v17 = vld [vmem:[%s617_s1 + $0x18] sm:$0xff] }
   0x7   :  { %75 = vmatpush.msra.mxu0 %v327_v7  ;;  %v342_v18 = vld [vmem:[%s617_s1 + $0xa0] sm:$0xff]  ;;  %v323_v19 = vld [vmem:[%s617_s1 + $0x58] sm:$0xff]  ;;  %v28_v20 = vld [vmem:[%s617_s1 + $0x10] sm:$0xff] }
   0x8   :  { %185 = vmatpush.msra.mxu2 %v345_v9  ;;  %123 = vmatpush.msra.mxu1 %v31_v11  ;;  %v341_v21 = vld [vmem:[%s617_s1 + $0x98] sm:$0xff]  ;;  %v322_v22 = vld [vmem:[%s617_s1 + $0x50] sm:$0xff]  ;;  %v27_v23 = vld [vmem:[%s617_s1 + $0x8] sm:$0xff] }
   0x9   :  { %76 = vmatpush.msra.mxu0 %v326_v10  ;;  %v340_v24 = vld [vmem:[%s617_s1 + $0x90] sm:$0xff]  ;;  %v321_v25 = vld [vmem:[%s617_s1 + $0x48] sm:$0xff] }
   0xa   :  { %186 = vmatpush.msra.mxu2 %v344_v12  ;;  %124 = vmatpush.msra.mxu1 %v30_v14 }
   0xb   :  { %77 = vmatpush.msra.mxu0 %v325_v13 }
   0xc   :  { %187 = vmatpush.msra.mxu2 %v343_v15  ;;  %125 = vmatpush.msra.mxu1 %v29_v17 }
   0xd   :  { %78 = vmatpush.msra.mxu0 %v324_v16 }
   0xe   :  { %188 = vmatpush.msra.mxu2 %v342_v18  ;;  %126 = vmatpush.msra.mxu1 %v28_v20 }
   0xf   :  { %79 = vmatpush.msra.mxu0 %v323_v19 }
  0x10   :  { %10 = vsyncpa [#allocation3], 0  ;;  %189 = vmatpush.msra.mxu2 %v341_v21  ;;  %vm50_vm0 = vcmask 588800   ;;  %v145_v26 = vld [vmem:[%s616_s0 + $0x2] sm:$0xff]  ;;  %127 = vmatpush.msra.mxu1 %v27_v23  ;;  %v146_v30 = vld [vmem:[%s616_s0 + $0xa] sm:$0xff]  ;;  %v226_v53 = vlaneseq  ;;  %vm240_vm1 = vcmask 1041408  }
  0x11   :  { %80 = vmatpush.msra.mxu0 %v322_v22  ;;  %v26_v27 = vld [vmem:[%s617_s1] sm:$0xff]  ;;  %v36_v31 = vld [vmem:[%s616_s0 + $0x9] sm:$0xff]  ;;  %v147_v33 = vld [vmem:[%s616_s0 + $0x12] sm:$0xff]  ;;  %v386_v19 = vmov 0.0   ;;  %vm236_vm5 = vcmask 277504   ;;  %s387_s6 = smov [#allocation2]  }
  0x12   :  { %v35_v28 = vld [vmem:[%s616_s0 + $0x1] sm:$0xff]  ;;  %190 = vmatpush.msra.mxu2 %v340_v24  ;;  %128 = vmatpush.msra.mxu1 %v26_v27  ;;  %v37_v34 = vld [vmem:[%s616_s0 + $0x11] sm:$0xff]  ;;  %v38_v37 = vld [vmem:[%s616_s0 + $0x19] sm:$0xff]  ;;  %v227_v58 = vshrl.u32 %v226_v53, 7  ;;  %v229_v8 = vand.u32 127, %v226_v53  ;;  %s310_s7 = sshll.u32 %s387_s6, 4  ;;  %s311_s7 = int_to_ptr.vmem [resolvable:$true] %s310_s7 }
  0x13   :  { %v21_v29 = vld [vmem:[%s616_s0] sm:$0xff]  ;;  %81 = vmatpush.msra.mxu0 %v321_v25  ;;  %349 = vmatmul.msk.f32.vlgmr.msra.gmra.mxu2 %vm50_vm0, %v145_v26  ;;  %v22_v32 = vld [vmem:[%s616_s0 + $0x8] sm:$0xff]  ;;  %v23_v35 = vld [vmem:[%s616_s0 + $0x10] sm:$0xff]  ;;  %s312_s10 = sshll.u32 %s621_s5, 4  ;;  %s313_s10 = int_to_ptr.hbm [resolvable:$true] %s312_s10 }
  0x14   :  { %330 = vmatmul.msk.f32.vlgmr.msra.gmra.mxu0 %vm50_vm0, %v35_v28  ;;  %335 = vmatmul.msk.f32.vlgmr.msra.gmra.mxu1 %vm50_vm0, %v21_v29  ;;  %v148_v36 = vld [vmem:[%s616_s0 + $0x1a] sm:$0xff]  ;;  %v149_v39 = vld [vmem:[%s616_s0 + $0x22] sm:$0x3]  ;;  %v230_v63 = vmul.u32 18, %v227_v58  ;;  %v278_v22 = vld [vmem:[%s619_s3 + $0x70] sm:$0xff] }
  0x15   :  { %v24_v38 = vld [vmem:[%s616_s0 + $0x18] sm:$0xff]  ;;  %v39_v40 = vld [vmem:[%s616_s0 + $0x21] sm:$0x3]  ;;  %v358_v4 = vld [vmem:[%s618_s2] ss:$0 sm:$0xff] }
  0x16   :  { %v25_v41 = vld [vmem:[%s616_s0 + $0x20] sm:$0x3]  ;;  %v232_v9 = vadd.s32 16, %v230_v63  ;;  %vm231_vm2 = vcmp.ge.s32.totalorder %v229_v8, %v230_v63  ;;  %v279_v21 = vld [vmem:[%s619_s3 + $0x78] sm:$0xff]  ;;  %v277_v23 = vld [vmem:[%s619_s3 + $0x68] sm:$0xff] }
  0x17   :  { %v276_v24 = vld [vmem:[%s619_s3 + $0x60] sm:$0xff]  ;;  %v275_v25 = vld [vmem:[%s619_s3 + $0x58] sm:$0xff]  ;;  %v274_v26 = vld [vmem:[%s619_s3 + $0x50] sm:$0xff] }
  0x18   :  { %vm233_vm3 = vcmp.lt.s32.totalorder %v229_v8, %v232_v9  ;;  %v273_v27 = vld [vmem:[%s619_s3 + $0x48] sm:$0xff]  ;;  %v272_v28 = vld [vmem:[%s619_s3 + $0x40] sm:$0xff]  ;;  %v271_v29 = vld [vmem:[%s619_s3 + $0x38] sm:$0xff] }
  0x19   :  { %vm234_vm4 = vmand %vm231_vm2, %vm233_vm3 }
  0x1a   :  { %v235_v20 = vsel %vm234_vm4, 1.0, %v386_v19 }
  0x1b   :  { %350 = vmatmul.msk.f32.gmra.mxu2 %vm50_vm0, %v146_v30  ;;  %v270_v30 = vld [vmem:[%s619_s3 + $0x30] sm:$0xff] }
  0x1c   :  { %331 = vmatmul.msk.f32.gmra.mxu0 %vm50_vm0, %v36_v31  ;;  %336 = vmatmul.msk.f32.gmra.mxu1 %vm50_vm0, %v22_v32  ;;  %v269_v31 = vld [vmem:[%s619_s3 + $0x28] sm:$0xff]  ;;  %v268_v32 = vld [vmem:[%s619_s3 + $0x20] sm:$0xff] }
  0x23   :  { %351 = vmatmul.msk.f32.gmra.mxu2 %vm50_vm0, %v147_v33  ;;  %v267_v33 = vld [vmem:[%s619_s3 + $0x18] sm:$0xff] }
  0x24   :  { %332 = vmatmul.msk.f32.gmra.mxu0 %vm50_vm0, %v37_v34  ;;  %337 = vmatmul.msk.f32.gmra.mxu1 %vm50_vm0, %v23_v35  ;;  %v266_v34 = vld [vmem:[%s619_s3 + $0x10] sm:$0xff]  ;;  %v265_v35 = vld [vmem:[%s619_s3 + $0x8] sm:$0xff] }
  0x2b   :  { %352 = vmatmul.msk.f32.gmra.mxu2 %vm50_vm0, %v148_v36  ;;  %v264_v36 = vld [vmem:[%s619_s3] sm:$0xff] }
  0x2c   :  { %333 = vmatmul.msk.f32.gmra.mxu0 %vm50_vm0, %v38_v37  ;;  %338 = vmatmul.msk.f32.gmra.mxu1 %vm50_vm0, %v24_v38  ;;  %v359_v38 = vld [vmem:[%s620_s4] ss:$0 sm:$0xff] }
  0x33   :  { %353 = vmatmul.msk.f32.gmra.mxu2 %vm50_vm0, %v149_v39 }
  0x34   :  { %334 = vmatmul.msk.f32.gmra.mxu0 %vm50_vm0, %v39_v40  ;;  %339 = vmatmul.msk.f32.gmra.mxu1 %vm50_vm0, %v25_v41 }
  0x91   :  { %v83_v42 = vpop.f32.mrf.mxu0  ;;  %v130_v43 = vpop.f32.mrf.mxu1 }
  0x92   :  { %v131_v1 = vadd.f32 %v130_v43, %v83_v42 }
  0x96   :  { %v192_v44 = vpop.f32.mrf.mxu2 }
  0x97   :  { %v207_v10 = vadd.f32 %v192_v44, %v131_v1 }
  0x99   :  { %v86_v45 = vpop.f32.mrf.mxu0  ;;  %v133_v46 = vpop.f32.mrf.mxu1  ;;  %v216_v16 = vadd.f32 %v358_v4, %v207_v10 }
  0x9a   :  { %v134_v61 = vadd.f32 %v133_v46, %v86_v45 }
  0x9b   :  { %v221_v18 = vmax.f32 %v216_v16, 0.0 }
  0x9e   :  { %v195_v47 = vpop.f32.mrf.mxu2 }
  0x9f   :  { %v208_v5 = vadd.f32 %v195_v47, %v134_v61 }
  0xa1   :  { %v89_v48 = vpop.f32.mrf.mxu0  ;;  %v136_v49 = vpop.f32.mrf.mxu1  ;;  %v217_v14 = vadd.f32 %v358_v4, %v208_v5 }
  0xa2   :  { %v137_v59 = vadd.f32 %v136_v49, %v89_v48 }
  0xa3   :  { %v222_v17 = vmax.f32 %v217_v14, 0.0 }
  0xa6   :  { %v198_v50 = vpop.f32.mrf.mxu2 }
  0xa7   :  { %v209_v2 = vadd.f32 %v198_v50, %v137_v59 }
  0xa9   :  { %v92_v51 = vpop.f32.mrf.mxu0  ;;  %v139_v52 = vpop.f32.mrf.mxu1  ;;  %v218_v12 = vadd.f32 %v358_v4, %v209_v2 }
  0xaa   :  { %v140_v55 = vadd.f32 %v139_v52, %v92_v51 }
  0xab   :  { %v223_v15 = vmax.f32 %v218_v12, 0.0 }
  0xae   :  { %v201_v54 = vpop.f32.mrf.mxu2 }
  0xaf   :  { %v210_v62 = vadd.f32 %v201_v54, %v140_v55 }
  0xb1   :  { %v95_v56 = vpop.f32.mrf.mxu0  ;;  %v142_v57 = vpop.f32.mrf.mxu1  ;;  %v219_v7 = vadd.f32 %v358_v4, %v210_v62 }
  0xb2   :  { %v143_v60 = vadd.f32 %v142_v57, %v95_v56 }
  0xb3   :  { %v224_v13 = vmax.f32 %v219_v7, 0.0 }
  0xb6   :  { %v204_v0 = vpop.f32.mrf.mxu2 }
  0xb7   :  { %v211_v3 = vadd.f32 %v204_v0, %v143_v60 }
  0xb9   :  { %v220_v6 = vadd.f32 %v358_v4, %v211_v3 }
  0xbb   :  { %v225_v11 = vmax.f32 %v220_v6, 0.0 }
  0xbd   :  { %354 = vmatpush.msk.msra.mxu3 %vm240_vm1, %v225_v11 }
  0xbf   :  { %256 = vmatpush.msra.mxu3 %v224_v13 }
  0xc1   :  { %257 = vmatpush.msra.mxu3 %v223_v15 }
  0xc3   :  { %258 = vmatpush.msra.mxu3 %v222_v17 }
  0xc5   :  { %259 = vmatpush.msra.mxu3 %v221_v18 }
  0xc6   :  { %355 = vmatmul.msk.f32.vlgmr.msra.gmra.mxu3 %vm236_vm5, %v235_v20 }
  0xc7   :  { %284 = vmatpush.msrb.mxu3 %v279_v21 }
  0xc9   :  { %285 = vmatpush.msrb.mxu3 %v278_v22 }
  0xcb   :  { %286 = vmatpush.msrb.mxu3 %v277_v23 }
  0xcd   :  { %287 = vmatpush.msrb.mxu3 %v276_v24 }
  0xcf   :  { %288 = vmatpush.msrb.mxu3 %v275_v25 }
  0xd1   :  { %289 = vmatpush.msrb.mxu3 %v274_v26 }
  0xd3   :  { %290 = vmatpush.msrb.mxu3 %v273_v27 }
  0xd5   :  { %291 = vmatpush.msrb.mxu3 %v272_v28 }
  0xd7   :  { %292 = vmatpush.msrb.mxu3 %v271_v29 }
  0xd9   :  { %293 = vmatpush.msrb.mxu3 %v270_v30 }
  0xdb   :  { %294 = vmatpush.msrb.mxu3 %v269_v31 }
  0xdd   :  { %295 = vmatpush.msrb.mxu3 %v268_v32 }
  0xdf   :  { %296 = vmatpush.msrb.mxu3 %v267_v33 }
  0xe1   :  { %297 = vmatpush.msrb.mxu3 %v266_v34 }
  0xe3   :  { %298 = vmatpush.msrb.mxu3 %v265_v35 }
  0xe5   :  { %299 = vmatpush.msrb.mxu3 %v264_v36 }
 0x149   :  { %v261_v37 = vpop.f32.mrf.mxu3 }
 0x14a   :  { %300 = vmatmul.f32.vlgmr.msrb.gmra.mxu3 %v261_v37 }
 0x1cd   :  { %v301_v39 = vpop.f32.mrf.mxu3 }
 0x1ce   :  { %v302_v40 = vadd.f32 %v359_v38, %v301_v39 }
 0x1d0   :  { %304 = vst [vmem:[#allocation2] sm:$0x3] %v302_v40 }
 0x1d1   :  { %315 = dma.vmem_to_hbm [thread:$0]  %s311_s7, 32, %s313_s10, [#allocation3]  }
 0x1d2   :  { %384 = dma.done.wait [#allocation3], 32  }
 0x1d3   :  { %385 = vsyncadd [#allocation3], 4294967264 }
 0x1d4   :  { %320 = vsyncpa [#allocation3], 1 }

</bundles_post_ra>
